<compile_context>
chip_gen: v6e
topology: v6e:2x2x1
jax: 0.10.0
libtpu: 0.0.40
codegen_flags: <defaults>
</compile_context>

<pallas_src>
import math

import jax
import jax.numpy as jnp
from jax.experimental import pallas as pl
from jax.experimental.pallas import tpu as pltpu

# ---------------- model hyper-params (small, deterministic) ----------------
B = 2        # batch
S = 8        # sequence length
D = 32       # d_model
H = 4        # num heads
DK = D // H  # per-head dim
DFF = 64     # feed-forward hidden dim
EPS = 1e-7
NEG_INF = -1e9


def _layernorm(x, alpha, bias):
    # x: (N, D); alpha/bias: (1, D).  Exact divide (accuracy > EUP slot here).
    mean = jnp.mean(x, axis=-1, keepdims=True)
    var = jnp.mean((x - mean) ** 2, axis=-1, keepdims=True)   # unbiased=False
    std = jnp.sqrt(var)
    return alpha * (x - mean) / (std + EPS) + bias


def encoder_block_kernel(x_ref, addm_ref, small_ref, wpack_ref, w2_ref, out_ref):
    BB = x_ref.shape[0]          # per-step batch (B for grid=(1,), 1 for grid=(B,))
    N = BB * S

    x = x_ref[...].reshape(N, D)                      # leading-dim merge (cheap)
    add_mask = addm_ref[...].reshape(N, N)            # unit-leading-dim squeeze

    small = small_ref[...]                            # (6, 128) f32
    ln1_a, ln1_b = small[0:1, :D], small[1:2, :D]
    ln2_a, ln2_b = small[2:3, :D], small[3:4, :D]
    bqkv = small[4:5, :3 * D]                         # bq already scaled by 1/sqrt(DK)
    bo = small[4:5, 3 * D:4 * D]
    b1 = small[5:6, :DFF]
    b2 = small[5:6, DFF:DFF + D]

    wpack = wpack_ref[...]                            # (D, 384) bf16, 128-lane slots
    wqkv = wpack[:, 0:3 * D]                          # (D, 96), Q cols pre-scaled
    wo = wpack[:, 128:128 + D]                        # (D, 32)
    w1 = wpack[:, 256:256 + DFF]                      # (D, 64)
    w2 = w2_ref[...]                                  # (DFF, D) bf16

    # ---- residual 1: x + Wo @ MHA(LN1(x)) ----
    ln1 = _layernorm(x, ln1_a, ln1_b)
    qkv = jnp.dot(ln1.astype(jnp.bfloat16), wqkv,
                  preferred_element_type=jnp.float32) + bqkv        # (N, 3D) f32

    # Head-major (H, N, DK) layout via one 2-D transpose + free sublane-split
    # reshape + batched minor-two swap (no per-head slicing / concatenation).
    qkvT = qkv.T                                                     # (3D, N)
    qh = jnp.swapaxes(qkvT[0:D].reshape(H, DK, N), -1, -2)           # (H, N, DK)
    kh = jnp.swapaxes(qkvT[D:2 * D].reshape(H, DK, N), -1, -2)
    vh = jnp.swapaxes(qkvT[2 * D:3 * D].reshape(H, DK, N), -1, -2)

    s = jnp.einsum("hqd,hkd->hqk", qh, kh,
                   preferred_element_type=jnp.float32)               # (H, N, N)
    s = s + add_mask                                                 # broadcast (N, N)
    s = s - jnp.max(s, axis=-1, keepdims=True)
    p = jnp.exp(s)
    p = p * pl.reciprocal(jnp.sum(p, axis=-1, keepdims=True), approx=True)
    o = jnp.einsum("hqk,hkd->hqd", p, vh,
                   preferred_element_type=jnp.float32)               # (H, N, DK)

    # Merge heads back to (N, D) with head-major columns.
    attn = jnp.swapaxes(o, -1, -2).reshape(D, N).T                   # (N, D)
    attn = jnp.dot(attn.astype(jnp.bfloat16), wo,
                   preferred_element_type=jnp.float32) + bo
    x1 = x + attn                                                    # dropout == identity

    # ---- residual 2: x1 + FFN(LN2(x1)) ----
    ln2 = _layernorm(x1, ln2_a, ln2_b)
    hdn = jnp.maximum(
        jnp.dot(ln2.astype(jnp.bfloat16), w1,
                preferred_element_type=jnp.float32) + b1, 0.0)
    ff = jnp.dot(hdn.astype(jnp.bfloat16), w2,
                 preferred_element_type=jnp.float32) + b2

    out_ref[...] = (x1 + ff).reshape(BB, S, D).astype(out_ref.dtype)


def pack_params(p):
    """One-time parameter packing (checkpoint prep): fold the 1/sqrt(DK) scale
    into Wq/bq, fuse Wqkv|Wo|W1 into one 128-lane-aligned bf16 slab, pack all
    LayerNorm params + biases into one small (6,128) f32 table."""
    scale = 1.0 / math.sqrt(DK)
    wqkv = jnp.concatenate([p["wq"] * scale, p["wk"], p["wv"]], axis=1)   # (D, 3D)

    wpack = jnp.zeros((D, 3 * 128), jnp.float32)
    wpack = wpack.at[:, 0:3 * D].set(wqkv)
    wpack = wpack.at[:, 128:128 + D].set(p["wo"])
    wpack = wpack.at[:, 256:256 + DFF].set(p["w1"])

    small = jnp.zeros((6, 128), jnp.float32)
    small = small.at[0, :D].set(p["ln1_a"][0])
    small = small.at[1, :D].set(p["ln1_b"][0])
    small = small.at[2, :D].set(p["ln2_a"][0])
    small = small.at[3, :D].set(p["ln2_b"][0])
    small = small.at[4, 0:D].set(p["bq"][0] * scale)
    small = small.at[4, D:2 * D].set(p["bk"][0])
    small = small.at[4, 2 * D:3 * D].set(p["bv"][0])
    small = small.at[4, 3 * D:4 * D].set(p["bo"][0])
    small = small.at[5, 0:DFF].set(p["b1"][0])
    small = small.at[5, DFF:DFF + D].set(p["b2"][0])

    return {
        "small": small,
        "wpack": wpack.astype(jnp.bfloat16),
        "w2": p["w2"].astype(jnp.bfloat16),
    }


def _additive_mask_fused(mask):
    """(B,1,S) key mask -> (1, B*S, B*S) block-diagonal additive mask."""
    key_ok = mask.reshape(B * S) != 0.0
    bid = jnp.arange(B * S, dtype=jnp.int32) // S
    valid = (bid[:, None] == bid[None, :]) & key_ok[None, :]
    return jnp.where(valid, 0.0, NEG_INF).astype(jnp.float32)[None, :, :]


def _additive_mask_per_batch(mask):
    """(B,1,S) key mask -> (B, S, S) per-batch additive mask."""
    valid = jnp.broadcast_to(mask != 0.0, (B, S, S))
    return jnp.where(valid, 0.0, NEG_INF).astype(jnp.float32)


def _use_batch_grid():
    # v7x has 2 TensorCores per chip -> shard the grid over batch there.
    # v5e/v6e have 1 TC -> keep a single-step grid (extra steps only add overhead).
    if B < 2:
        return False
    try:
        return "v7" in jax.devices()[0].device_kind.lower()
    except Exception:
        return False


def encoder_block(x, mask, packed):
    """x: (B, S, D) f32, mask: (B, 1, S) f32, packed: output of pack_params."""
    batch_grid = _use_batch_grid()

    if batch_grid:
        addm = _additive_mask_per_batch(mask)                        # (B, S, S)
        grid = (B,)
        semantics = ("parallel",)
        x_spec = pl.BlockSpec((1, S, D), lambda b: (b, 0, 0))
        m_spec = pl.BlockSpec((1, S, S), lambda b: (b, 0, 0))
        out_spec = pl.BlockSpec((1, S, D), lambda b: (b, 0, 0))
        p_idx = lambda b: (0, 0)
    else:
        addm = _additive_mask_fused(mask)                            # (1, B*S, B*S)
        grid = (1,)
        semantics = ("arbitrary",)
        x_spec = pl.BlockSpec((B, S, D), lambda i: (0, 0, 0))
        m_spec = pl.BlockSpec((1, B * S, B * S), lambda i: (0, 0, 0))
        out_spec = pl.BlockSpec((B, S, D), lambda i: (0, 0, 0))
        p_idx = lambda i: (0, 0)

    small_spec = pl.BlockSpec((6, 128), p_idx)
    wpack_spec = pl.BlockSpec((D, 3 * 128), p_idx)
    w2_spec = pl.BlockSpec((DFF, D), p_idx)

    call = pl.pallas_call(
        encoder_block_kernel,
        out_shape=jax.ShapeDtypeStruct((B, S, D), jnp.float32),
        grid_spec=pltpu.PrefetchScalarGridSpec(
            num_scalar_prefetch=0,
            grid=grid,
            in_specs=[x_spec, m_spec, small_spec, wpack_spec, w2_spec],
            out_specs=out_spec,
        ),
        compiler_params=pltpu.CompilerParams(dimension_semantics=semantics),
    )
    return call(x, addm, packed["small"], packed["wpack"], packed["w2"])


# ---------------- pure-JAX reference (mirrors the PyTorch forward) ----------------
def reference(x, mask, p):
    def ln(y, a, b):
        mean = jnp.mean(y, axis=-1, keepdims=True)
        std = jnp.sqrt(jnp.mean((y - mean) ** 2, axis=-1, keepdims=True))
        return a * (y - mean) / (std + EPS) + b

    ln1 = ln(x, p["ln1_a"][0], p["ln1_b"][0])
    q = ln1 @ p["wq"] + p["bq"][0]
    k = ln1 @ p["wk"] + p["bk"][0]
    v = ln1 @ p["wv"] + p["bv"][0]
    qh = q.reshape(B, S, H, DK).transpose(0, 2, 1, 3)
    kh = k.reshape(B, S, H, DK).transpose(0, 2, 1, 3)
    vh = v.reshape(B, S, H, DK).transpose(0, 2, 1, 3)
    s = jnp.einsum("bhqd,bhkd->bhqk", qh, kh) / math.sqrt(DK)
    s = jnp.where(mask[:, None, :, :] == 0.0, NEG_INF, s)   # mask (B,1,S)->(B,1,1,S)
    pa = jax.nn.softmax(s, axis=-1)
    o = jnp.einsum("bhqk,bhkd->bhqd", pa, vh).transpose(0, 2, 1, 3).reshape(B, S, D)
    x1 = x + (o @ p["wo"] + p["bo"][0])
    ln2 = ln(x1, p["ln2_a"][0], p["ln2_b"][0])
    ff = jnp.maximum(ln2 @ p["w1"] + p["b1"][0], 0.0) @ p["w2"] + p["b2"][0]
    return x1 + ff


def init_params(key):
    ks = jax.random.split(key, 8)
    init = lambda k, shape: (0.05 * jax.random.normal(k, shape)).astype(jnp.float32)
    return {
        "ln1_a": jnp.ones((1, D), jnp.float32),
        "ln1_b": jnp.zeros((1, D), jnp.float32),
        "wq": init(ks[0], (D, D)), "bq": init(ks[1], (1, D)),
        "wk": init(ks[2], (D, D)), "bk": jnp.zeros((1, D), jnp.float32),
        "wv": init(ks[3], (D, D)), "bv": jnp.zeros((1, D), jnp.float32),
        "wo": init(ks[4], (D, D)), "bo": jnp.zeros((1, D), jnp.float32),
        "ln2_a": jnp.ones((1, D), jnp.float32),
        "ln2_b": jnp.zeros((1, D), jnp.float32),
        "w1": init(ks[5], (D, DFF)), "b1": jnp.zeros((1, DFF), jnp.float32),
        "w2": init(ks[6], (DFF, D)), "b2": jnp.zeros((1, D), jnp.float32),
    }


if __name__ == "__main__":
    key = jax.random.PRNGKey(0)
    kx, kp = jax.random.split(key)
    x = jax.random.normal(kx, (B, S, D), jnp.float32)

    # mask: batch 0 attends to all positions, batch 1 has last 2 keys masked
    mask = jnp.ones((B, 1, S), jnp.float32)
    mask = mask.at[1, 0, S - 2:].set(0.0)

    params = init_params(kp)
    packed = pack_params(params)

    out = encoder_block(x, mask, packed)
    out = jax.block_until_ready(out)

    ref = reference(x, mask, params)
    assert out.shape == (B, S, D)
    err = float(jnp.max(jnp.abs(out - ref)))
    # Tolerance 5e-3 covers bf16 matmul operands (f32 accumulation) and the
    # EUP approximate reciprocal used only for the softmax denominator;
    # LayerNorm uses an exact divide.
    assert jnp.allclose(out, ref, rtol=5e-3, atol=5e-3), f"max abs diff {err}"

    print("KERNEL_OK")
</pallas_src>

<mosaic_0001>
module attributes {stable_mosaic.version = 11 : i64} {
  func.func @encoder_block_kernel(%arg0: i32, %arg1: memref<2x8x32xf32, #tpu.memory_space<vmem>>, %arg2: memref<1x16x16xf32, #tpu.memory_space<vmem>>, %arg3: memref<6x128xf32, #tpu.memory_space<vmem>>, %arg4: memref<32x384xbf16, #tpu.memory_space<vmem>>, %arg5: memref<64x32xbf16, #tpu.memory_space<vmem>>, %arg6: memref<2x8x32xf32, #tpu.memory_space<vmem>>) attributes {dimension_semantics = [#tpu.dimension_semantics<arbitrary>], iteration_bounds = array<i64: 1>, scalar_prefetch = 0 : i64, scratch_operands = 0 : i64, tpu.core_type = #tpu.core_type<tc>, window_params = [{pipeline_mode = #tpu.pipeline_mode<synchronous>, transform_indices = @transform_0, window_bounds = array<i64: 2, 8, 32>}, {pipeline_mode = #tpu.pipeline_mode<synchronous>, transform_indices = @transform_1, window_bounds = array<i64: 1, 16, 16>}, {pipeline_mode = #tpu.pipeline_mode<synchronous>, transform_indices = @transform_2, window_bounds = array<i64: 6, 128>}, {pipeline_mode = #tpu.pipeline_mode<synchronous>, transform_indices = @transform_3, window_bounds = array<i64: 32, 384>}, {pipeline_mode = #tpu.pipeline_mode<synchronous>, transform_indices = @transform_4, window_bounds = array<i64: 64, 32>}, {pipeline_mode = #tpu.pipeline_mode<synchronous>, transform_indices = @transform_5, window_bounds = array<i64: 2, 8, 32>}]} {
    %c0 = arith.constant 0 : index
    %c0_0 = arith.constant 0 : index
    %c0_1 = arith.constant 0 : index
    %0 = vector.load %arg1[%c0, %c0_0, %c0_1] : memref<2x8x32xf32, #tpu.memory_space<vmem>>, vector<2x8x32xf32>
    %1 = vector.shape_cast %0 : vector<2x8x32xf32> to vector<16x32xf32>
    %c0_2 = arith.constant 0 : index
    %c0_3 = arith.constant 0 : index
    %c0_4 = arith.constant 0 : index
    %2 = vector.load %arg2[%c0_2, %c0_3, %c0_4] : memref<1x16x16xf32, #tpu.memory_space<vmem>>, vector<1x16x16xf32>
    %3 = vector.shape_cast %2 : vector<1x16x16xf32> to vector<16x16xf32>
    %c0_5 = arith.constant 0 : index
    %c0_6 = arith.constant 0 : index
    %4 = vector.load %arg3[%c0_5, %c0_6] : memref<6x128xf32, #tpu.memory_space<vmem>>, vector<6x128xf32>
    %5 = vector.extract_strided_slice %4 {offsets = [0, 0], sizes = [1, 32], strides = [1, 1]} : vector<6x128xf32> to vector<1x32xf32>
    %6 = vector.extract_strided_slice %4 {offsets = [1, 0], sizes = [1, 32], strides = [1, 1]} : vector<6x128xf32> to vector<1x32xf32>
    %7 = vector.extract_strided_slice %4 {offsets = [2, 0], sizes = [1, 32], strides = [1, 1]} : vector<6x128xf32> to vector<1x32xf32>
    %8 = vector.extract_strided_slice %4 {offsets = [3, 0], sizes = [1, 32], strides = [1, 1]} : vector<6x128xf32> to vector<1x32xf32>
    %9 = vector.extract_strided_slice %4 {offsets = [4, 0], sizes = [1, 96], strides = [1, 1]} : vector<6x128xf32> to vector<1x96xf32>
    %10 = vector.extract_strided_slice %4 {offsets = [4, 96], sizes = [1, 32], strides = [1, 1]} : vector<6x128xf32> to vector<1x32xf32>
    %11 = vector.extract_strided_slice %4 {offsets = [5, 0], sizes = [1, 64], strides = [1, 1]} : vector<6x128xf32> to vector<1x64xf32>
    %12 = vector.extract_strided_slice %4 {offsets = [5, 64], sizes = [1, 32], strides = [1, 1]} : vector<6x128xf32> to vector<1x32xf32>
    %c0_7 = arith.constant 0 : index
    %c0_8 = arith.constant 0 : index
    %13 = vector.load %arg4[%c0_7, %c0_8] : memref<32x384xbf16, #tpu.memory_space<vmem>>, vector<32x384xbf16>
    %14 = vector.extract_strided_slice %13 {offsets = [0, 0], sizes = [32, 96], strides = [1, 1]} : vector<32x384xbf16> to vector<32x96xbf16>
    %15 = vector.extract_strided_slice %13 {offsets = [0, 128], sizes = [32, 32], strides = [1, 1]} : vector<32x384xbf16> to vector<32x32xbf16>
    %16 = vector.extract_strided_slice %13 {offsets = [0, 256], sizes = [32, 64], strides = [1, 1]} : vector<32x384xbf16> to vector<32x64xbf16>
    %c0_9 = arith.constant 0 : index
    %c0_10 = arith.constant 0 : index
    %17 = vector.load %arg5[%c0_9, %c0_10] : memref<64x32xbf16, #tpu.memory_space<vmem>>, vector<64x32xbf16>
    %cst = arith.constant dense<0.000000e+00> : vector<16xf32>
    %18 = vector.multi_reduction <add>, %1, %cst [1] : vector<16x32xf32> to vector<16xf32>
    %19 = vector.shape_cast %18 : vector<16xf32> to vector<16x1xf32>
    %cst_11 = arith.constant 3.200000e+01 : f32
    %20 = vector.broadcast %cst_11 : f32 to vector<16x1xf32>
    %21 = arith.divf %19, %20 : vector<16x1xf32>
    %22 = vector.broadcast %21 : vector<16x1xf32> to vector<16x32xf32>
    %23 = arith.subf %1, %22 : vector<16x32xf32>
    %24 = arith.mulf %23, %23 : vector<16x32xf32>
    %cst_12 = arith.constant dense<0.000000e+00> : vector<16xf32>
    %25 = vector.multi_reduction <add>, %24, %cst_12 [1] : vector<16x32xf32> to vector<16xf32>
    %26 = vector.shape_cast %25 : vector<16xf32> to vector<16x1xf32>
    %cst_13 = arith.constant 3.200000e+01 : f32
    %27 = vector.broadcast %cst_13 : f32 to vector<16x1xf32>
    %28 = arith.divf %26, %27 : vector<16x1xf32>
    %29 = math.sqrt %28 : vector<16x1xf32>
    %30 = vector.broadcast %21 : vector<16x1xf32> to vector<16x32xf32>
    %31 = arith.subf %1, %30 : vector<16x32xf32>
    %32 = vector.broadcast %5 : vector<1x32xf32> to vector<16x32xf32>
    %33 = arith.mulf %32, %31 : vector<16x32xf32>
    %cst_14 = arith.constant 1.000000e-07 : f32
    %34 = vector.broadcast %cst_14 : f32 to vector<16x1xf32>
    %35 = arith.addf %29, %34 : vector<16x1xf32>
    %36 = vector.broadcast %35 : vector<16x1xf32> to vector<16x32xf32>
    %37 = arith.divf %33, %36 : vector<16x32xf32>
    %38 = vector.broadcast %6 : vector<1x32xf32> to vector<16x32xf32>
    %39 = arith.addf %37, %38 : vector<16x32xf32>
    %40 = arith.truncf %39 : vector<16x32xf32> to vector<16x32xbf16>
    %cst_15 = arith.constant dense<0.000000e+00> : vector<16x96xf32>
    %41 = tpu.matmul %40, %14, %cst_15 {dimension_numbers = #tpu.dot_dimension_numbers<[1], [0], [0], [1], [0, 0, 1, 1], [], []>} : vector<16x32xbf16>, vector<32x96xbf16>, vector<16x96xf32> -> vector<16x96xf32>
    %42 = vector.broadcast %9 : vector<1x96xf32> to vector<16x96xf32>
    %43 = arith.addf %41, %42 : vector<16x96xf32>
    %44 = tpu.transpose %43, [1, 0] : vector<16x96xf32> -> vector<96x16xf32>
    %45 = vector.extract_strided_slice %44 {offsets = [0, 0], sizes = [32, 16], strides = [1, 1]} : vector<96x16xf32> to vector<32x16xf32>
    %46 = vector.shape_cast %45 : vector<32x16xf32> to vector<4x8x16xf32>
    %47 = tpu.transpose %46, [0, 2, 1] : vector<4x8x16xf32> -> vector<4x16x8xf32>
    %48 = vector.extract_strided_slice %44 {offsets = [32, 0], sizes = [32, 16], strides = [1, 1]} : vector<96x16xf32> to vector<32x16xf32>
    %49 = vector.shape_cast %48 : vector<32x16xf32> to vector<4x8x16xf32>
    %50 = tpu.transpose %49, [0, 2, 1] : vector<4x8x16xf32> -> vector<4x16x8xf32>
    %51 = vector.extract_strided_slice %44 {offsets = [64, 0], sizes = [32, 16], strides = [1, 1]} : vector<96x16xf32> to vector<32x16xf32>
    %52 = vector.shape_cast %51 : vector<32x16xf32> to vector<4x8x16xf32>
    %53 = tpu.transpose %52, [0, 2, 1] : vector<4x8x16xf32> -> vector<4x16x8xf32>
    "tpu.trace_start"() <{level = 10 : i32, message = "hqd,hkd->hqk"}> : () -> ()
    %cst_16 = arith.constant dense<0.000000e+00> : vector<4x16x16xf32>
    %54 = tpu.matmul %47, %50, %cst_16 {dimension_numbers = #tpu.dot_dimension_numbers<[2], [2], [1], [1], [0, 0, 0, 1, 1, 1], [0], [0]>} : vector<4x16x8xf32>, vector<4x16x8xf32>, vector<4x16x16xf32> -> vector<4x16x16xf32>
    "tpu.trace_stop"() : () -> ()
    %55 = vector.shape_cast %3 : vector<16x16xf32> to vector<1x16x16xf32>
    %56 = vector.broadcast %55 : vector<1x16x16xf32> to vector<4x16x16xf32>
    %57 = arith.addf %54, %56 : vector<4x16x16xf32>
    %cst_17 = arith.constant dense<0xFF800000> : vector<4x16xf32>
    %58 = vector.multi_reduction <maximumf>, %57, %cst_17 [2] : vector<4x16x16xf32> to vector<4x16xf32>
    %59 = vector.shape_cast %58 : vector<4x16xf32> to vector<4x16x1xf32>
    %60 = vector.broadcast %59 : vector<4x16x1xf32> to vector<4x16x16xf32>
    %61 = arith.subf %57, %60 : vector<4x16x16xf32>
    %62 = math.exp %61 : vector<4x16x16xf32>
    %cst_18 = arith.constant dense<0.000000e+00> : vector<4x16xf32>
    %63 = vector.multi_reduction <add>, %62, %cst_18 [2] : vector<4x16x16xf32> to vector<4x16xf32>
    %64 = vector.shape_cast %63 : vector<4x16xf32> to vector<4x16x1xf32>
    %65 = tpu.reciprocal %64 {approx = true} : vector<4x16x1xf32> -> vector<4x16x1xf32>
    %66 = vector.broadcast %65 : vector<4x16x1xf32> to vector<4x16x16xf32>
    %67 = arith.mulf %62, %66 : vector<4x16x16xf32>
    "tpu.trace_start"() <{level = 10 : i32, message = "hqk,hkd->hqd"}> : () -> ()
    %cst_19 = arith.constant dense<0.000000e+00> : vector<4x16x8xf32>
    %68 = tpu.matmul %67, %53, %cst_19 {dimension_numbers = #tpu.dot_dimension_numbers<[2], [1], [1], [2], [0, 0, 0, 1, 1, 2], [0], [0]>} : vector<4x16x16xf32>, vector<4x16x8xf32>, vector<4x16x8xf32> -> vector<4x16x8xf32>
    "tpu.trace_stop"() : () -> ()
    %69 = tpu.transpose %68, [0, 2, 1] : vector<4x16x8xf32> -> vector<4x8x16xf32>
    %70 = vector.shape_cast %69 : vector<4x8x16xf32> to vector<32x16xf32>
    %71 = tpu.transpose %70, [1, 0] : vector<32x16xf32> -> vector<16x32xf32>
    %72 = arith.truncf %71 : vector<16x32xf32> to vector<16x32xbf16>
    %cst_20 = arith.constant dense<0.000000e+00> : vector<16x32xf32>
    %73 = tpu.matmul %72, %15, %cst_20 {dimension_numbers = #tpu.dot_dimension_numbers<[1], [0], [0], [1], [0, 0, 1, 1], [], []>} : vector<16x32xbf16>, vector<32x32xbf16>, vector<16x32xf32> -> vector<16x32xf32>
    %74 = vector.broadcast %10 : vector<1x32xf32> to vector<16x32xf32>
    %75 = arith.addf %73, %74 : vector<16x32xf32>
    %76 = arith.addf %1, %75 : vector<16x32xf32>
    %cst_21 = arith.constant dense<0.000000e+00> : vector<16xf32>
    %77 = vector.multi_reduction <add>, %76, %cst_21 [1] : vector<16x32xf32> to vector<16xf32>
    %78 = vector.shape_cast %77 : vector<16xf32> to vector<16x1xf32>
    %cst_22 = arith.constant 3.200000e+01 : f32
    %79 = vector.broadcast %cst_22 : f32 to vector<16x1xf32>
    %80 = arith.divf %78, %79 : vector<16x1xf32>
    %81 = vector.broadcast %80 : vector<16x1xf32> to vector<16x32xf32>
    %82 = arith.subf %76, %81 : vector<16x32xf32>
    %83 = arith.mulf %82, %82 : vector<16x32xf32>
    %cst_23 = arith.constant dense<0.000000e+00> : vector<16xf32>
    %84 = vector.multi_reduction <add>, %83, %cst_23 [1] : vector<16x32xf32> to vector<16xf32>
    %85 = vector.shape_cast %84 : vector<16xf32> to vector<16x1xf32>
    %cst_24 = arith.constant 3.200000e+01 : f32
    %86 = vector.broadcast %cst_24 : f32 to vector<16x1xf32>
    %87 = arith.divf %85, %86 : vector<16x1xf32>
    %88 = math.sqrt %87 : vector<16x1xf32>
    %89 = vector.broadcast %80 : vector<16x1xf32> to vector<16x32xf32>
    %90 = arith.subf %76, %89 : vector<16x32xf32>
    %91 = vector.broadcast %7 : vector<1x32xf32> to vector<16x32xf32>
    %92 = arith.mulf %91, %90 : vector<16x32xf32>
    %cst_25 = arith.constant 1.000000e-07 : f32
    %93 = vector.broadcast %cst_25 : f32 to vector<16x1xf32>
    %94 = arith.addf %88, %93 : vector<16x1xf32>
    %95 = vector.broadcast %94 : vector<16x1xf32> to vector<16x32xf32>
    %96 = arith.divf %92, %95 : vector<16x32xf32>
    %97 = vector.broadcast %8 : vector<1x32xf32> to vector<16x32xf32>
    %98 = arith.addf %96, %97 : vector<16x32xf32>
    %99 = arith.truncf %98 : vector<16x32xf32> to vector<16x32xbf16>
    %cst_26 = arith.constant dense<0.000000e+00> : vector<16x64xf32>
    %100 = tpu.matmul %99, %16, %cst_26 {dimension_numbers = #tpu.dot_dimension_numbers<[1], [0], [0], [1], [0, 0, 1, 1], [], []>} : vector<16x32xbf16>, vector<32x64xbf16>, vector<16x64xf32> -> vector<16x64xf32>
    %101 = vector.broadcast %11 : vector<1x64xf32> to vector<16x64xf32>
    %102 = arith.addf %100, %101 : vector<16x64xf32>
    %cst_27 = arith.constant 0.000000e+00 : f32
    %103 = vector.broadcast %cst_27 : f32 to vector<16x64xf32>
    %104 = arith.maximumf %102, %103 : vector<16x64xf32>
    %105 = arith.truncf %104 : vector<16x64xf32> to vector<16x64xbf16>
    %cst_28 = arith.constant dense<0.000000e+00> : vector<16x32xf32>
    %106 = tpu.matmul %105, %17, %cst_28 {dimension_numbers = #tpu.dot_dimension_numbers<[1], [0], [0], [1], [0, 0, 1, 1], [], []>} : vector<16x64xbf16>, vector<64x32xbf16>, vector<16x32xf32> -> vector<16x32xf32>
    %107 = vector.broadcast %12 : vector<1x32xf32> to vector<16x32xf32>
    %108 = arith.addf %106, %107 : vector<16x32xf32>
    %109 = arith.addf %76, %108 : vector<16x32xf32>
    %110 = vector.shape_cast %109 : vector<16x32xf32> to vector<2x8x32xf32>
    %c0_29 = arith.constant 0 : index
    %c0_30 = arith.constant 0 : index
    %c0_31 = arith.constant 0 : index
    %111 = vector.load %arg6[%c0_29, %c0_30, %c0_31] : memref<2x8x32xf32, #tpu.memory_space<vmem>>, vector<2x8x32xf32>
    tpu.vector_store %arg6[%c0_29, %c0_30, %c0_31], %110 {strides = array<i32>} : memref<2x8x32xf32, #tpu.memory_space<vmem>>, vector<2x8x32xf32>,
    return
  }
  func.func @transform_0(%arg0: i32) -> (i32, i32, i32) {
    %c0_i32 = arith.constant 0 : i32
    %c0_i32_0 = arith.constant 0 : i32
    %c0_i32_1 = arith.constant 0 : i32
    %c0_i32_2 = arith.constant 0 : i32
    return %c0_i32, %c0_i32_0, %c0_i32_1 : i32, i32, i32
  }
  func.func @transform_1(%arg0: i32) -> (i32, i32, i32) {
    %c0_i32 = arith.constant 0 : i32
    %c0_i32_0 = arith.constant 0 : i32
    %c0_i32_1 = arith.constant 0 : i32
    %c0_i32_2 = arith.constant 0 : i32
    return %c0_i32, %c0_i32_0, %c0_i32_1 : i32, i32, i32
  }
  func.func @transform_2(%arg0: i32) -> (i32, i32) {
    %c0_i32 = arith.constant 0 : i32
    %c0_i32_0 = arith.constant 0 : i32
    %c0_i32_1 = arith.constant 0 : i32
    return %c0_i32, %c0_i32_0 : i32, i32
  }
  func.func @transform_3(%arg0: i32) -> (i32, i32) {
    %c0_i32 = arith.constant 0 : i32
    %c0_i32_0 = arith.constant 0 : i32
    %c0_i32_1 = arith.constant 0 : i32
    return %c0_i32, %c0_i32_0 : i32, i32
  }
  func.func @transform_4(%arg0: i32) -> (i32, i32) {
    %c0_i32 = arith.constant 0 : i32
    %c0_i32_0 = arith.constant 0 : i32
    %c0_i32_1 = arith.constant 0 : i32
    return %c0_i32, %c0_i32_0 : i32, i32
  }
  func.func @transform_5(%arg0: i32) -> (i32, i32, i32) {
    %c0_i32 = arith.constant 0 : i32
    %c0_i32_0 = arith.constant 0 : i32
    %c0_i32_1 = arith.constant 0 : i32
    %c0_i32_2 = arith.constant 0 : i32
    return %c0_i32, %c0_i32_0, %c0_i32_1 : i32, i32, i32
  }
}

</mosaic_0001>

<bundles_post_ra>
// kernel: tpu_custom_call.1
= control target key start
LH: loop header
LB: loop body
LE: loop exit
PB: predicated region body
PF: predicated region fallthrough
CT: control target
= control target key end

     0   :  { %10 = vsyncpa [#allocation3], 0  ;;  %s2070_s0 = inlined_call_operand.hbm [shape: f32[2,8,32], index: 0, kind: input, shape index: {}]   ;;  %s2071_s1 = inlined_call_operand.hbm [shape: f32[1,16,16], index: 1, kind: input, shape index: {}]   ;;  %s2072_s2 = inlined_call_operand.hbm [shape: f32[6,128], index: 2, kind: input, shape index: {}]   ;;  %s2073_s3 = inlined_call_operand.vmem [shape: bf16[32,384], index: 3, kind: input, shape index: {}]   ;;  %s2074_s4 = inlined_call_operand.vmem [shape: bf16[64,32], index: 4, kind: input, shape index: {}]   ;;  %s2075_s5 = inlined_call_operand.hbm [shape: f32[2,8,32], index: 5, kind: output, shape index: {}]  }
   0x1   :  { %11 = vsyncpa [#allocation6], 0 }
   0x2   :  { %12 = vsyncpa [#allocation4], 0  ;;  %s1859_s18 = smov [#allocation5]   ;;  %s1860_s20 = smov [#allocation2]  }
   0x3   :  { %s30_s19 = sshll.u32 %s1859_s18, 4  ;;  %s18_s21 = sshll.u32 %s1860_s20, 4  ;;  %s31_s19 = int_to_ptr.vmem [resolvable:$true] %s30_s19  ;;  %s19_s21 = int_to_ptr.vmem [resolvable:$true] %s18_s21 }
   0x4   :  { %s1781_s22 = scalar_lea.vmem %s31_s19, 256  ;;  %p1786_p1 = scmp.lt.s32.totalorder %s31_s19, %s31_s19 }
   0x5   :  { %p1782_p0 = scmp.ne.s32.totalorder %s31_s19, %s1781_s22  ;;  %p1787_p2 = scmp.lt.s32.totalorder %s1781_s22, %s1781_s22 }
   0x7   :  { %p1788_p3 = por %p1787_p2, %p1786_p1 }
   0x9   :  { %p1789_p4 = pnand %p1788_p3, %p1782_p0 }
   0xb   :  { %1792 = shalt.err (!%p1789_p4)
}
   0xc   :  { %s1861_s23 = smov 128   ;;  %s1862_s24 = smov 8  }
   0xd   :  { %36 = dma.hbm_to_vmem [thread:$0]  %s2071_s1, 256, %s31_s19, [#allocation6], %s1861_s23, %s1861_s23, %s1862_s24  }
   0xe   :  { %s1801_s27 = scalar_lea.vmem %s19_s21, 256  ;;  %p1806_p6 = scmp.lt.s32.totalorder %s19_s21, %s19_s21 }
   0xf   :  { %p1802_p5 = scmp.ne.s32.totalorder %s19_s21, %s1801_s27  ;;  %p1807_p7 = scmp.lt.s32.totalorder %s1801_s27, %s1801_s27 }
  0x11   :  { %p1808_p8 = por %p1807_p7, %p1806_p6 }
  0x13   :  { %p1809_p9 = pnand %p1808_p8, %p1802_p5 }
  0x15   :  { %1812 = shalt.err (!%p1809_p9)
}
  0x16   :  { %24 = dma.hbm_to_vmem [thread:$0]  %s2070_s0, 256, %s19_s21, [#allocation3], %s1861_s23, %s1861_s23, %s1862_s24  }
  0x17   :  { %s1863_s30 = smov [#allocation7]  }
  0x18   :  { %s43_s6 = sshll.u32 %s1863_s30, 4  ;;  %s44_s6 = int_to_ptr.vmem [resolvable:$true] %s43_s6 }
  0x19   :  { %s1821_s7 = scalar_lea.vmem %s44_s6, 128  ;;  %p1826_p11 = scmp.lt.s32.totalorder %s44_s6, %s44_s6 }
  0x1a   :  { %p1822_p10 = scmp.ne.s32.totalorder %s44_s6, %s1821_s7  ;;  %p1827_p12 = scmp.lt.s32.totalorder %s1821_s7, %s1821_s7 }
  0x1c   :  { %p1828_p13 = por %p1827_p12, %p1826_p11 }
  0x1e   :  { %p1829_p0 = pnand %p1828_p13, %p1822_p10 }
  0x20   :  { %1832 = shalt.err (!%p1829_p0)
}
  0x21   :  { %46 = dma.hbm_to_vmem [thread:$0]  %s2072_s2, 128, %s44_s6, [#allocation6]  }
  0x22   :  { %1853 = dma.done.wait [#allocation3], 256  }
  0x23   :  { %1854 = vsyncadd [#allocation3], 4294967040 }
  0x24   :  { %1855 = dma.done.wait [#allocation6], 384  }
  0x25   :  { %1856 = vsyncadd [#allocation6], 4294966912  ;;  %vm82_vm0 = vcmask 261120   ;;  %v1914_v0 = vld [vmem:[#allocation2] sm:$0xff]  ;;  %v1916_v1 = vld [vmem:[#allocation2 + $0x8] sm:$0xff]  ;;  %v1864_v15 = vmov 0.0   ;;  %v118_v27 = vlaneseq }
  0x26   :  { %v83_v2 = vsel %vm82_vm0, %v1914_v0, 0.0  ;;  %v86_v3 = vsel %vm82_vm0, %v1916_v1, 0.0  ;;  %v1713_v14 = vld [vmem:[%s2073_s3 + $0x18] ss:$12 sps:$4 sm:$0xff]   ;;  %1609 = vmatprep.subr.bf16.mxu0 %v1864_v15  ;;  %vm1865_vm1 = vmmov 0   ;;  %vm682_vm6 = vcmask 130048  }
  0x27   :  { %84 = vadd.xlane.f32.xlu0 %v83_v2  ;;  %1613 = vmatprep.mubr.msk.bf16.mxu0 %vm1865_vm1, %v1864_v15  ;;  %v1716_v16 = vld [vmem:[%s2073_s3] ss:$12 sps:$4 sm:$0xff]   ;;  %v1936_v33 = vshrl.u32 %v118_v27, 7  ;;  %vm357_vm7 = vcmask 64512   ;;  %s1866_s15 = smov 32   ;;  %s1867_s29 = smov 64  }
  0x28   :  { %1610 = vmatpush3.bf16.msra.mxu0 %v1713_v14  ;;  %v1939_v36 = vld [vmem:[#allocation7] sm:$0x3f]  ;;  %vm1470_vm12 = vcmask 523264  }
  0x29   :  { %1611 = vmatprep.subr.bf16.mxu0 %v1864_v15  ;;  %v120_v35 = vsub.s32 0, %v1936_v33  ;;  %v132_v38 = vsub.s32 1, %v1936_v33  ;;  %v139_v49 = vsub.s32 4, %v1936_v33 }
  0x2b   :  { %87 = vadd.xlane.f32.xlu0 %v86_v3  ;;  %v121_v37 = vrot.slane %v1939_v36, %v120_v35  ;;  %v133_v43 = vrot.slane %v1939_v36, %v132_v38  ;;  %v1947_v50 = vrot.slane %v1939_v36, %v139_v49 }
  0x2c   :  { %1612 = vmatpush3.bf16.msra.mxu0 %v1716_v16  ;;  %v64_v16 = vld [vmem:[#allocation5 + $0x8] sm:$0xff] }
  0xb0   :  { %v85_v4 = vpop.xlane.xlu0 %84 }
  0xb1   :  { %v90_v5 = vmul.f32 0.03125, %v85_v4 }
  0xb3   :  { %v92_v6 = vsub.f32 %v1914_v0, %v90_v5 }
  0xb4   :  { %v88_v7 = vpop.xlane.xlu0 %87 }
  0xb5   :  { %v91_v8 = vmul.f32 0.03125, %v88_v7  ;;  %v94_v9 = vmul.f32 %v92_v6, %v92_v6  ;;  %v122_v40 = vmul.f32 %v121_v37, %v92_v6 }
  0xb7   :  { %v93_v10 = vsub.f32 %v1916_v1, %v91_v8  ;;  %v96_v11 = vsel %vm82_vm0, %v94_v9, 0.0 }
  0xb8   :  { %97 = vadd.xlane.f32.xlu1 %v96_v11 }
  0xb9   :  { %v95_v12 = vmul.f32 %v93_v10, %v93_v10  ;;  %v123_v41 = vmul.f32 %v121_v37, %v93_v10 }
  0xbb   :  { %v99_v13 = vsel %vm82_vm0, %v95_v12, 0.0 }
  0xbc   :  { %100 = vadd.xlane.f32.xlu1 %v99_v13 }
 0x141   :  { %v98_v17 = vpop.xlane.xlu1 %97 }
 0x142   :  { %v102_v18 = vmul.f32 0.03125, %v98_v17 }
 0x144   :  { %1725 = vrsqrt.f32 %v102_v18  ;;  %vm106_vm2 = vcmp.eq.f32.partialorder %v102_v18, inf  ;;  %v109_v23 = vand.u32 2147483648, %v102_v18  ;;  %vm108_vm3 = vcmp.eq.f32.partialorder %v102_v18, 0.0 }
 0x145   :  { %v101_v19 = vpop.xlane.xlu1 %100 }
 0x146   :  { %v103_v20 = vmul.f32 0.03125, %v101_v19 }
 0x148   :  { %1727 = vrsqrt.f32 %v103_v20  ;;  %vm113_vm4 = vcmp.eq.f32.partialorder %v103_v20, inf  ;;  %v116_v30 = vand.u32 2147483648, %v103_v20  ;;  %vm115_vm5 = vcmp.eq.f32.partialorder %v103_v20, 0.0 }
 0x151   :  { %v1726_v21 = vpop.eup %1725 }
 0x152   :  { %v105_v22 = vmul.f32 %v1726_v21, %v102_v18 }
 0x154   :  { %v107_v24 = vsel %vm106_vm2, %v102_v18, %v105_v22  ;;  %v63_v18 = vld [vmem:[#allocation5] sm:$0xff] }
 0x155   :  { %v1728_v25 = vpop.eup %1727  ;;  %v110_v26 = vsel %vm108_vm3, %v109_v23, %v107_v24 }
 0x156   :  { %v124_v28 = vadd.f32 1e-07, %v110_v26  ;;  %v112_v29 = vmul.f32 %v1728_v25, %v103_v20 }
 0x158   :  { %1729 = vrcp.f32 %v124_v28  ;;  %v114_v31 = vsel %vm113_vm4, %v103_v20, %v112_v29 }
 0x159   :  { %v117_v32 = vsel %vm115_vm5, %v116_v30, %v114_v31 }
 0x15a   :  { %v125_v34 = vadd.f32 1e-07, %v117_v32 }
 0x15c   :  { %1731 = vrcp.f32 %v125_v34 }
 0x165   :  { %v1730_v39 = vpop.eup %1729 }
 0x166   :  { %v127_v42 = vmul.f32 %v1730_v39, %v122_v40 }
 0x168   :  { %v134_v46 = vadd.f32 %v133_v43, %v127_v42 }
 0x169   :  { %v1732_v44 = vpop.eup %1731 }
 0x16a   :  { %v129_v45 = vmul.f32 %v1732_v44, %v123_v41 }
 0x16c   :  { %v135_v47 = vadd.f32 %v133_v43, %v129_v45 }
 0x16e   :  { %v136_v48 = vpack.c.bf16 %v135_v47, %v134_v46 }
 0x170   :  { %1614 = vmatmul.mubr.msk.bf16.vlgmr.msra.gmra.mxu0 %vm82_vm0, %v136_v48 }
 0x230   :  { %v190_v51 = vpop.f32.mrf.mxu0 }
 0x231   :  { %v191_v52 = vadd.f32 %v190_v51, %v1947_v50 }
 0x232   :  { %v1615_v53 = vpop.f32.mrf.mxu0 }
 0x233   :  { %197 = vxpose.xlu0.b32.start [1/2] (short) (narrow) %v191_v52, 96 }
 0x234   :  { %v193_v54 = vpop.f32.mrf.mxu0 }
 0x235   :  { %v194_v55 = vadd.f32 %v193_v54, %v1947_v50 }
 0x236   :  { %v1616_v56 = vpop.f32.mrf.mxu0 }
 0x237   :  { %198 = vxpose.xlu0.b32.end [2/2] (short) (narrow) %v194_v55, 96 }
 0x2af   :  { %v213_v57 = vpop.trf.xlu0 }
 0x2b0   :  { %229 = vxpose.xlu1.b32.start.end [1/1] (short) (narrow) %v213_v57, 16 }
 0x2b3   :  { %v214_v58 = vpop.trf.xlu0 }
 0x2b4   :  { %261 = vxpose.xlu0.b32.start.end [1/1] (short) (narrow) %v214_v58, 16 }
 0x2b7   :  { %v215_v59 = vpop.trf.xlu0 }
 0x2b8   :  { %293 = vxpose.xlu1.b32.start.end [1/1] (short) (narrow) %v215_v59, 16 }
 0x2bb   :  { %v216_v60 = vpop.trf.xlu0 }
 0x2bd   :  { %325 = vxpose.xlu1.b32.start.end [1/1] (short) (narrow) %v216_v60, 16 }
 0x2bf   :  { %v217_v61 = vpop.trf.xlu0 }
 0x2c0   :  { %1617 = vmatprep.subr.mxu1 %v217_v61 }
 0x2c1   :  { %1618 = vmatpush3.msra.mxu1 %v217_v61 }
 0x2c3   :  { %v218_v62 = vpop.trf.xlu0 }
 0x2c4   :  { %1622 = vmatprep.subr.mxu1 %v218_v62 }
 0x2c7   :  { %v219_v63 = vpop.trf.xlu0 }
 0x2cb   :  { %v220_v2 = vpop.trf.xlu0 }
 0x2cf   :  { %v221_v3 = vpop.trf.xlu0 }
 0x2d0   :  { %1637 = vmatprep.subr.msk.mxu0 %vm682_vm6, %v221_v3 }
 0x2d1   :  { %1638 = vmatpush3.xpose.msk.msra.mxu0 %vm682_vm6, %v221_v3 }
 0x2d3   :  { %v222_v4 = vpop.trf.xlu0 }
 0x2d7   :  { %v1953_v5 = vpop.trf.xlu0 }
 0x2d8   :  { %1647 = vmatprep.subr.msk.mxu0 %vm682_vm6, %v1953_v5 }
 0x2db   :  { %v1957_v6 = vpop.trf.xlu0 }
 0x32c   :  { %v245_v7 = vpop.trf.xlu1 }
 0x32d   :  { %1619 = vmatprep.mubr.msk.f32.mxu1 %vm357_vm7, %v245_v7 }
 0x330   :  { %v246_v8 = vpop.trf.xlu1  ;;  %v277_v9 = vpop.trf.xlu0 }
 0x331   :  { %1620 = vmatmul.mubr.msk.f32.vlgmr.msra.gmra.mxu1 %vm357_vm7, %v246_v8 }
 0x332   :  { %1623 = vmatpush3.msra.mxu1 %v218_v62  ;;  %1624 = vmatprep.mubr.msk.f32.mxu1 %vm357_vm7, %v277_v9 }
 0x333   :  { %1627 = vmatprep.subr.mxu1 %v219_v63 }
 0x334   :  { %v309_v10 = vpop.trf.xlu1  ;;  %v278_v11 = vpop.trf.xlu0 }
 0x335   :  { %1625 = vmatmul.mubr.msk.f32.vlgmr.msra.gmra.mxu1 %vm357_vm7, %v278_v11 }
 0x336   :  { %1628 = vmatpush3.msra.mxu1 %v219_v63  ;;  %1629 = vmatprep.mubr.msk.f32.mxu1 %vm357_vm7, %v309_v10 }
 0x337   :  { %1632 = vmatprep.subr.mxu1 %v220_v2 }
 0x338   :  { %v310_v12 = vpop.trf.xlu1 }
 0x339   :  { %1630 = vmatmul.mubr.msk.f32.vlgmr.msra.gmra.mxu1 %vm357_vm7, %v310_v12 }
 0x33a   :  { %1633 = vmatpush3.msra.mxu1 %v220_v2 }
 0x33b   :  { %1642 = vmatprep.subr.msk.mxu1 %vm682_vm6, %v222_v4 }
 0x33c   :  { %v341_v13 = vpop.trf.xlu1 }
 0x33d   :  { %1634 = vmatprep.mubr.msk.f32.mxu1 %vm357_vm7, %v341_v13 }
 0x340   :  { %v342_v14 = vpop.trf.xlu1 }
 0x341   :  { %1635 = vmatmul.mubr.msk.f32.vlgmr.msra.gmra.mxu1 %vm357_vm7, %v342_v14 }
 0x342   :  { %1643 = vmatpush3.xpose.msk.msra.mxu1 %vm682_vm6, %v222_v4 }
 0x343   :  { %1652 = vmatprep.subr.msk.mxu1 %vm682_vm6, %v1957_v6 }
 0x3f1   :  { %v1621_v17 = vpop.f32.mrf.mxu1 }
 0x3f2   :  { %v436_v19 = vadd.f32 %v1621_v17, %v64_v16 }
 0x3f3   :  { %v430_v20 = vpop.f32.mrf.mxu1 }
 0x3f4   :  { %v431_v21 = vadd.f32 %v430_v20, %v63_v18  ;;  %v686_v22 = vsel %vm682_vm6, %v436_v19, -inf }
 0x3f5   :  { %687 = vmax.xlane.f32.xlu0 %v686_v22  ;;  %v1626_v23 = vpop.f32.mrf.mxu1 }
 0x3f6   :  { %v517_v24 = vadd.f32 %v1626_v23, %v64_v16  ;;  %v683_v25 = vsel %vm682_vm6, %v431_v21, -inf }
 0x3f7   :  { %684 = vmax.xlane.f32.xlu1 %v683_v25  ;;  %v511_v26 = vpop.f32.mrf.mxu1 }
 0x3f8   :  { %v692_v27 = vsel %vm682_vm6, %v517_v24, -inf  ;;  %v512_v28 = vadd.f32 %v511_v26, %v63_v18 }
 0x3f9   :  { %v1631_v29 = vpop.f32.mrf.mxu1 }
 0x3fa   :  { %v598_v30 = vadd.f32 %v1631_v29, %v64_v16  ;;  %v689_v31 = vsel %vm682_vm6, %v512_v28, -inf }
 0x3fb   :  { %693 = vmax.xlane.f32.xlu1 %v692_v27  ;;  %v592_v32 = vpop.f32.mrf.mxu1 }
 0x3fc   :  { %v593_v35 = vadd.f32 %v592_v32, %v63_v18  ;;  %v698_v37 = vsel %vm682_vm6, %v598_v30, -inf }
 0x3fe   :  { %v695_v40 = vsel %vm682_vm6, %v593_v35, -inf }
 0x3ff   :  { %690 = vmax.xlane.f32.xlu1 %v689_v31 }
 0x401   :  { %v1636_v34 = vpop.f32.mrf.mxu1 }
 0x402   :  { %v679_v41 = vadd.f32 %v1636_v34, %v64_v16 }
 0x403   :  { %699 = vmax.xlane.f32.xlu1 %v698_v37  ;;  %v673_v38 = vpop.f32.mrf.mxu1 }
 0x404   :  { %v674_v39 = vadd.f32 %v673_v38, %v63_v18  ;;  %v704_v43 = vsel %vm682_vm6, %v679_v41, -inf }
 0x406   :  { %v701_v42 = vsel %vm682_vm6, %v674_v39, -inf }
 0x407   :  { %696 = vmax.xlane.f32.xlu1 %v695_v40 }
 0x40b   :  { %702 = vmax.xlane.f32.xlu1 %v701_v42 }
 0x40f   :  { %705 = vmax.xlane.f32.xlu1 %v704_v43 }
 0x47e   :  { %v688_v44 = vpop.xlane.xlu0 %687 }
 0x47f   :  { %v708_v45 = vsub.f32 %v436_v19, %v688_v44 }
 0x480   :  { %v685_v46 = vpop.xlane.xlu1 %684 }
 0x481   :  { %v717_v47 = vmul.f32 1.442695, %v708_v45  ;;  %v707_v48 = vsub.f32 %v431_v21, %v685_v46 }
 0x483   :  { %1733 = vpow2.f32 %v717_v47  ;;  %v715_v49 = vmul.f32 1.442695, %v707_v48 }
 0x484   :  { %v694_v51 = vpop.xlane.xlu1 %693 }
 0x485   :  { %1735 = vpow2.f32 %v715_v49  ;;  %v710_v52 = vsub.f32 %v517_v24, %v694_v51 }
 0x487   :  { %v721_v53 = vmul.f32 1.442695, %v710_v52  ;;  %v1718_v52 = vld [vmem:[%s2073_s3 + $0x4] ss:$12 sps:$4 sm:$0xff]  }
 0x488   :  { %v691_v54 = vpop.xlane.xlu1 %690 }
 0x489   :  { %1737 = vpow2.f32 %v721_v53  ;;  %v709_v55 = vsub.f32 %v512_v28, %v691_v54 }
 0x48b   :  { %v719_v56 = vmul.f32 1.442695, %v709_v55 }
 0x48c   :  { %v700_v57 = vpop.xlane.xlu1 %699 }
 0x48d   :  { %1739 = vpow2.f32 %v719_v56  ;;  %v712_v58 = vsub.f32 %v598_v30, %v700_v57 }
 0x48f   :  { %v725_v59 = vmul.f32 1.442695, %v712_v58 }
 0x490   :  { %v1734_v60 = vpop.eup %1733  ;;  %v697_v61 = vpop.xlane.xlu1 %696 }
 0x491   :  { %1741 = vpow2.f32 %v725_v59  ;;  %v711_v62 = vsub.f32 %v593_v35, %v697_v61  ;;  %v734_v63 = vsel %vm682_vm6, %v1734_v60, 0.0 }
 0x492   :  { %v1736_v2 = vpop.eup %1735  ;;  %735 = vadd.xlane.f32.xlu1 %v734_v63 }
 0x493   :  { %v723_v3 = vmul.f32 1.442695, %v711_v62  ;;  %v731_v8 = vsel %vm682_vm6, %v1736_v2, 0.0 }
 0x494   :  { %v703_v4 = vpop.xlane.xlu1 %702 }
 0x495   :  { %1743 = vpow2.f32 %v723_v3  ;;  %v713_v7 = vsub.f32 %v674_v39, %v703_v4 }
 0x496   :  { %v1738_v9 = vpop.eup %1737  ;;  %732 = vadd.xlane.f32.xlu1 %v731_v8 }
 0x497   :  { %v727_v10 = vmul.f32 1.442695, %v713_v7  ;;  %v740_v11 = vsel %vm682_vm6, %v1738_v9, 0.0 }
 0x498   :  { %741 = vadd.xlane.f32.xlu0 %v740_v11  ;;  %v706_v12 = vpop.xlane.xlu1 %705 }
 0x499   :  { %1745 = vpow2.f32 %v727_v10  ;;  %v714_v13 = vsub.f32 %v679_v41, %v706_v12 }
 0x49a   :  { %v1740_v14 = vpop.eup %1739 }
 0x49b   :  { %v729_v16 = vmul.f32 1.442695, %v714_v13  ;;  %v737_v17 = vsel %vm682_vm6, %v1740_v14, 0.0 }
 0x49c   :  { %738 = vadd.xlane.f32.xlu1 %v737_v17 }
 0x49d   :  { %1747 = vpow2.f32 %v729_v16 }
 0x49e   :  { %v1742_v18 = vpop.eup %1741 }
 0x49f   :  { %v746_v19 = vsel %vm682_vm6, %v1742_v18, 0.0 }
 0x4a0   :  { %747 = vadd.xlane.f32.xlu0 %v746_v19 }
 0x4a2   :  { %v1744_v20 = vpop.eup %1743 }
 0x4a3   :  { %v743_v21 = vsel %vm682_vm6, %v1744_v20, 0.0 }
 0x4a4   :  { %744 = vadd.xlane.f32.xlu1 %v743_v21 }
 0x4a6   :  { %v1746_v22 = vpop.eup %1745 }
 0x4a7   :  { %v749_v23 = vsel %vm682_vm6, %v1746_v22, 0.0 }
 0x4a8   :  { %750 = vadd.xlane.f32.xlu1 %v749_v23 }
 0x4aa   :  { %v1748_v24 = vpop.eup %1747 }
 0x4ab   :  { %v752_v25 = vsel %vm682_vm6, %v1748_v24, 0.0 }
 0x4ac   :  { %753 = vadd.xlane.f32.xlu0 %v752_v25 }
 0x51b   :  { %v736_v26 = vpop.xlane.xlu1 %735 }
 0x51c   :  { %1749 = vrcp.f32 %v736_v26 }
 0x51f   :  { %v733_v27 = vpop.xlane.xlu1 %732 }
 0x520   :  { %1751 = vrcp.f32 %v733_v27 }
 0x521   :  { %v742_v28 = vpop.xlane.xlu0 %741 }
 0x522   :  { %1753 = vrcp.f32 %v742_v28 }
 0x525   :  { %v739_v29 = vpop.xlane.xlu1 %738 }
 0x526   :  { %1755 = vrcp.f32 %v739_v29 }
 0x529   :  { %v748_v30 = vpop.xlane.xlu0 %747  ;;  %v1750_v31 = vpop.eup %1749 }
 0x52a   :  { %1757 = vrcp.f32 %v748_v30  ;;  %v764_v37 = vmul.f32 %v1750_v31, %v1734_v60 }
 0x52d   :  { %v1752_v32 = vpop.eup %1751  ;;  %v745_v34 = vpop.xlane.xlu1 %744 }
 0x52e   :  { %1759 = vrcp.f32 %v745_v34  ;;  %v763_v35 = vmul.f32 %v1752_v32, %v1736_v2  ;;  %v1719_v34 = vld [vmem:[%s2073_s3 + $0x20] ss:$12 sps:$4 sm:$0xff]  }
 0x52f   :  { %v1754_v39 = vpop.eup %1753 }
 0x530   :  { %1639 = vmatprep.mubr.msk.f32.mxu0 %vm682_vm6, %v763_v35  ;;  %v766_v43 = vmul.f32 %v1754_v39, %v1738_v9  ;;  %v1720_v35 = vld [vmem:[%s2073_s3 + $0x8] ss:$12 sps:$4 sm:$0xff]  }
 0x531   :  { %1640 = vmatmul.mubr.msk.f32.vlgmr.msra.gmra.mxu0 %vm682_vm6, %v764_v37  ;;  %v751_v38 = vpop.xlane.xlu1 %750  ;;  %v1721_v37 = vld [vmem:[%s2074_s4 + $0x18] sm:$0xff]  }
 0x532   :  { %1648 = vmatpush3.xpose.msk.msra.mxu0 %vm682_vm6, %v1953_v5  ;;  %1761 = vrcp.f32 %v751_v38 }
 0x533   :  { %v1756_v40 = vpop.eup %1755  ;;  %1673 = vmatprep.subr.bf16.mxu0 %v1864_v15 }
 0x534   :  { %v765_v41 = vmul.f32 %v1756_v40, %v1740_v14 }
 0x535   :  { %v754_v42 = vpop.xlane.xlu0 %753 }
 0x536   :  { %1763 = vrcp.f32 %v754_v42  ;;  %1644 = vmatprep.mubr.msk.f32.mxu1 %vm682_vm6, %v765_v41 }
 0x537   :  { %1645 = vmatmul.mubr.msk.f32.vlgmr.msra.gmra.mxu1 %vm682_vm6, %v766_v43  ;;  %v1758_v44 = vpop.eup %1757 }
 0x538   :  { %1653 = vmatpush3.xpose.msk.msra.mxu1 %vm682_vm6, %v1957_v6  ;;  %v768_v46 = vmul.f32 %v1758_v44, %v1742_v18  ;;  %v1715_v6 = vld [vmem:[%s2073_s3 + $0x1c] ss:$12 sps:$4 sm:$0xff]  }
 0x539   :  { %1657 = vmatprep.subr.bf16.mxu1 %v1864_v15 }
 0x53b   :  { %v1760_v45 = vpop.eup %1759 }
 0x53c   :  { %v767_v5 = vmul.f32 %v1760_v45, %v1744_v20 }
 0x53e   :  { %1649 = vmatprep.mubr.msk.f32.mxu0 %vm682_vm6, %v767_v5 }
 0x53f   :  { %v1762_v47 = vpop.eup %1761  ;;  %1650 = vmatmul.mubr.msk.f32.vlgmr.msra.gmra.mxu0 %vm682_vm6, %v768_v46 }
 0x540   :  { %v769_v48 = vmul.f32 %v1762_v47, %v1746_v22  ;;  %1681 = vmatprep.mubr.msk.bf16.mxu0 %vm1865_vm1, %v1864_v15  ;;  %1674 = vmatpush3.bf16.msra.mxu0 %v1721_v37 }
 0x541   :  { %1675 = vmatprep.subr.bf16.mxu0 %v1864_v15 }
 0x542   :  { %1654 = vmatprep.mubr.msk.f32.mxu1 %vm682_vm6, %v769_v48 }
 0x543   :  { %v1764_v49 = vpop.eup %1763 }
 0x544   :  { %v770_v51 = vmul.f32 %v1764_v49, %v1748_v24 }
 0x546   :  { %1655 = vmatmul.mubr.msk.f32.vlgmr.msra.gmra.mxu1 %vm682_vm6, %v770_v51 }
 0x547   :  { %1658 = vmatpush3.bf16.msra.mxu1 %v1715_v6  ;;  %1661 = vmatprep.mubr.msk.bf16.mxu1 %vm1865_vm1, %v1864_v15 }
 0x548   :  { %1659 = vmatprep.subr.bf16.mxu1 %v1864_v15 }
 0x54b   :  { %1660 = vmatpush3.bf16.msra.mxu1 %v1718_v52 }
 0x54c   :  { %1665 = vmatprep.subr.bf16.mxu1 %v1864_v15 }
 0x5f1   :  { %v1641_v53 = vpop.f32.mrf.mxu0 }
 0x5f3   :  { %v846_v55 = vpop.f32.mrf.mxu0 }
 0x5f7   :  { %v1646_v54 = vpop.f32.mrf.mxu1 }
 0x5f8   :  { %v1697_v58 = vpack.i.bf16 %v1646_v54, %v1641_v53  ;;  %v1362_v53 = vsub.s32 2, %v1936_v33 }
 0x5f9   :  { %v930_v56 = vpop.f32.mrf.mxu1 }
 0x5fa   :  { %v1695_v57 = vpack.i.bf16 %v930_v56, %v846_v55  ;;  %v1363_v54 = vrot.slane %v1939_v36, %v1362_v53  ;;  %v1374_v55 = vsub.s32 3, %v1936_v33 }
 0x5fc   :  { %1696 = vxpose.xlu1.b32.start [1/2] (short) (narrow) %v1695_v57, 8 }
 0x5ff   :  { %v1651_v59 = vpop.f32.mrf.mxu0 }
 0x600   :  { %1698 = vxpose.xlu1.b32.end [2/2] (short) (narrow) %v1697_v58, 8 }
 0x601   :  { %v1014_v61 = vpop.f32.mrf.mxu0 }
 0x606   :  { %v1656_v60 = vpop.f32.mrf.mxu1 }
 0x607   :  { %v1706_v2 = vpack.i.bf16 %v1656_v60, %v1651_v59  ;;  %v1375_v60 = vrot.slane %v1939_v36, %v1374_v55 }
 0x608   :  { %v1098_v62 = vpop.f32.mrf.mxu1 }
 0x609   :  { %v1704_v63 = vpack.i.bf16 %v1098_v62, %v1014_v61 }
 0x60b   :  { %1705 = vxpose.xlu0.b32.start [1/2] (short) (narrow) %v1704_v63, 8 }
 0x60f   :  { %1707 = vxpose.xlu0.b32.end [2/2] (short) (narrow) %v1706_v2, 8 }
 0x61e   :  { %1277 = vrot.lane.b32.xlu1 %v1947_v50, %s1866_s15 }
 0x678   :  { %v1699_v3 = vpop.trf.xlu1 }
 0x679   :  { %v1700_v4 = vunpack.i.l.bf16 %v1699_v3  ;;  %v1703_v7 = vunpack.i.h.bf16 %v1699_v3 }
 0x67b   :  { %1235 = vxpose.xlu0.b32.start [1/4] (short) (narrow) %v1700_v4, 16  ;;  %v1722_v4 = vld [vmem:[%s2074_s4 + $0x10] sm:$0xff]  }
 0x67c   :  { %1676 = vmatpush3.bf16.msra.mxu0 %v1722_v4 }
 0x67d   :  { %1677 = vmatprep.subr.bf16.mxu0 %v1864_v15 }
 0x67f   :  { %1236 = vxpose.xlu0.b32.cont [2/4] (short) (narrow) %v1703_v7, 16  ;;  %v1723_v7 = vld [vmem:[%s2074_s4 + $0x8] sm:$0xff]  }
 0x680   :  { %1678 = vmatpush3.bf16.msra.mxu0 %v1723_v7 }
 0x681   :  { %1679 = vmatprep.subr.bf16.mxu0 %v1864_v15 }
 0x687   :  { %v1708_v8 = vpop.trf.xlu0 }
 0x688   :  { %v1709_v9 = vunpack.i.l.bf16 %v1708_v8  ;;  %v1712_v10 = vunpack.i.h.bf16 %v1708_v8  ;;  %v1381_v8 = vsub.s32 5, %v1936_v33 }
 0x68a   :  { %1237 = vxpose.xlu0.b32.cont [3/4] (short) (narrow) %v1709_v9, 16  ;;  %v1724_v9 = vld [vmem:[%s2074_s4] sm:$0xff]   ;;  %s1868_s4 = smov [#allocation8]  }
 0x68b   :  { %1680 = vmatpush3.bf16.msra.mxu0 %v1724_v9  ;;  %s1524_s30 = sshll.u32 %s1868_s4, 4  ;;  %s1525_s30 = int_to_ptr.vmem [resolvable:$true] %s1524_s30 }
 0x68c   :  { %s1833_s6 = scalar_lea.vmem %s1525_s30, 256  ;;  %p1838_p2 = scmp.lt.s32.totalorder %s1525_s30, %s1525_s30 }
 0x68d   :  { %p1834_p1 = scmp.ne.s32.totalorder %s1525_s30, %s1833_s6  ;;  %p1839_p3 = scmp.lt.s32.totalorder %s1833_s6, %s1833_s6 }
 0x68e   :  { %1238 = vxpose.xlu0.b32.end [4/4] (short) (narrow) %v1712_v10, 16  ;;  %v1382_v10 = vrot.slane %v1939_v36, %v1381_v8 }
 0x68f   :  { %p1840_p4 = por %p1839_p3, %p1838_p2 }
 0x690   :  { %v1278_v14 = vpop.permute.xlu1 %1277 }
 0x691   :  { %p1841_p5 = pnand %p1840_p4, %p1834_p1 }
 0x6fe   :  { %v1251_v11 = vpop.trf.xlu0 }
 0x702   :  { %v1252_v12 = vpop.trf.xlu0 }
 0x703   :  { %v1267_v13 = vpack.c.bf16 %v1252_v12, %v1251_v11 }
 0x705   :  { %1662 = vmatmul.mubr.msk.bf16.vlgmr.msra.gmra.mxu1 %vm82_vm0, %v1267_v13 }
 0x706   :  { %1669 = vmatprep.mubr.msk.bf16.mxu1 %vm1865_vm1, %v1864_v15  ;;  %1666 = vmatpush3.bf16.msra.mxu1 %v1719_v34 }
 0x707   :  { %1667 = vmatprep.subr.bf16.mxu1 %v1864_v15 }
 0x70a   :  { %1668 = vmatpush3.bf16.msra.mxu1 %v1720_v35 }
 0x7c5   :  { %v1317_v16 = vpop.f32.mrf.mxu1 }
 0x7c6   :  { %v1318_v17 = vadd.f32 %v1317_v16, %v1278_v14 }
 0x7c7   :  { %v1663_v18 = vpop.f32.mrf.mxu1 }
 0x7c8   :  { %v2018_v19 = vadd.f32 %v1318_v17, %v1914_v0 }
 0x7c9   :  { %v1320_v50 = vpop.f32.mrf.mxu1 }
 0x7ca   :  { %v1321_v20 = vadd.f32 %v1320_v50, %v1278_v14  ;;  %v1326_v21 = vsel %vm82_vm0, %v2018_v19, 0.0 }
 0x7cb   :  { %1327 = vadd.xlane.f32.xlu0 %v1326_v21  ;;  %v1664_v22 = vpop.f32.mrf.mxu1 }
 0x7cc   :  { %v2023_v23 = vadd.f32 %v1321_v20, %v1916_v1 }
 0x7ce   :  { %v1329_v24 = vsel %vm82_vm0, %v2023_v23, 0.0 }
 0x7cf   :  { %1330 = vadd.xlane.f32.xlu1 %v1329_v24 }
 0x854   :  { %v1328_v25 = vpop.xlane.xlu0 %1327 }
 0x855   :  { %v1332_v26 = vmul.f32 0.03125, %v1328_v25 }
 0x857   :  { %v1334_v27 = vsub.f32 %v2018_v19, %v1332_v26 }
 0x858   :  { %v1331_v0 = vpop.xlane.xlu1 %1330 }
 0x859   :  { %v1333_v28 = vmul.f32 0.03125, %v1331_v0  ;;  %v1336_v29 = vmul.f32 %v1334_v27, %v1334_v27  ;;  %v1364_v57 = vmul.f32 %v1363_v54, %v1334_v27 }
 0x85b   :  { %v1335_v30 = vsub.f32 %v2023_v23, %v1333_v28  ;;  %v1338_v31 = vsel %vm82_vm0, %v1336_v29, 0.0 }
 0x85c   :  { %1339 = vadd.xlane.f32.xlu0 %v1338_v31 }
 0x85d   :  { %v1337_v32 = vmul.f32 %v1335_v30, %v1335_v30  ;;  %v1365_v58 = vmul.f32 %v1363_v54, %v1335_v30 }
 0x85f   :  { %v1341_v1 = vsel %vm82_vm0, %v1337_v32, 0.0 }
 0x860   :  { %1342 = vadd.xlane.f32.xlu0 %v1341_v1 }
 0x876   :  { %1467 = vrot.lane.b32.xlu0 %v1382_v10, %s1867_s29 }
 0x8e5   :  { %v1340_v38 = vpop.xlane.xlu0 %1339 }
 0x8e6   :  { %v1344_v39 = vmul.f32 0.03125, %v1340_v38 }
 0x8e8   :  { %1765 = vrsqrt.f32 %v1344_v39  ;;  %vm1348_vm8 = vcmp.eq.f32.partialorder %v1344_v39, inf  ;;  %v1351_v44 = vand.u32 2147483648, %v1344_v39  ;;  %vm1350_vm9 = vcmp.eq.f32.partialorder %v1344_v39, 0.0 }
 0x8e9   :  { %v1343_v40 = vpop.xlane.xlu0 %1342 }
 0x8ea   :  { %v1345_v41 = vmul.f32 0.03125, %v1343_v40 }
 0x8ec   :  { %1767 = vrsqrt.f32 %v1345_v41  ;;  %vm1355_vm10 = vcmp.eq.f32.partialorder %v1345_v41, inf  ;;  %v1358_v49 = vand.u32 2147483648, %v1345_v41  ;;  %vm1357_vm11 = vcmp.eq.f32.partialorder %v1345_v41, 0.0 }
 0x8ed   :  { %v1468_v15 = vpop.permute.xlu0 %1467 }
 0x8f5   :  { %v1766_v42 = vpop.eup %1765 }
 0x8f6   :  { %v1347_v43 = vmul.f32 %v1766_v42, %v1344_v39 }
 0x8f8   :  { %v1349_v45 = vsel %vm1348_vm8, %v1344_v39, %v1347_v43 }
 0x8f9   :  { %v1768_v5 = vpop.eup %1767  ;;  %v1352_v46 = vsel %vm1350_vm9, %v1351_v44, %v1349_v45 }
 0x8fa   :  { %v1366_v47 = vadd.f32 1e-07, %v1352_v46  ;;  %v1354_v48 = vmul.f32 %v1768_v5, %v1345_v41 }
 0x8fc   :  { %1769 = vrcp.f32 %v1366_v47  ;;  %v1356_v6 = vsel %vm1355_vm10, %v1345_v41, %v1354_v48 }
 0x8fd   :  { %v1359_v51 = vsel %vm1357_vm11, %v1358_v49, %v1356_v6 }
 0x8fe   :  { %v1367_v52 = vadd.f32 1e-07, %v1359_v51 }
 0x900   :  { %1771 = vrcp.f32 %v1367_v52 }
 0x909   :  { %v1770_v56 = vpop.eup %1769 }
 0x90a   :  { %v1369_v59 = vmul.f32 %v1770_v56, %v1364_v57 }
 0x90c   :  { %v1376_v63 = vadd.f32 %v1375_v60, %v1369_v59 }
 0x90d   :  { %v1772_v61 = vpop.eup %1771 }
 0x90e   :  { %v1371_v62 = vmul.f32 %v1772_v61, %v1365_v58 }
 0x910   :  { %v1377_v2 = vadd.f32 %v1375_v60, %v1371_v62 }
 0x912   :  { %v1378_v3 = vpack.c.bf16 %v1377_v2, %v1376_v63 }
 0x914   :  { %1670 = vmatmul.mubr.msk.bf16.vlgmr.msra.gmra.mxu1 %vm82_vm0, %v1378_v3 }
 0x9d4   :  { %v1432_v11 = vpop.f32.mrf.mxu1 }
 0x9d5   :  { %v1433_v13 = vadd.f32 %v1432_v11, %v1382_v10 }
 0x9d6   :  { %v1671_v12 = vpop.f32.mrf.mxu1 }
 0x9d7   :  { %v1439_v18 = vmax.f32 %v1433_v13, 0.0 }
 0x9d8   :  { %v1435_v14 = vpop.f32.mrf.mxu1 }
 0x9d9   :  { %v1436_v16 = vadd.f32 %v1435_v14, %v1382_v10 }
 0x9da   :  { %v1672_v17 = vpop.f32.mrf.mxu1 }
 0x9db   :  { %v1440_v50 = vmax.f32 %v1436_v16, 0.0 }
 0x9dd   :  { %v1441_v33 = vpack.c.bf16 %v1440_v50, %v1439_v18 }
 0x9df   :  { %1682 = vmatmul.mubr.msk.bf16.vlgmr.msra.gmra.mxu0 %vm1470_vm12, %v1441_v33 }
 0xa9f   :  { %v1508_v20 = vpop.f32.mrf.mxu0 }
 0xaa0   :  { %v1509_v21 = vadd.f32 %v1508_v20, %v1468_v15 }
 0xaa1   :  { %v1683_v22 = vpop.f32.mrf.mxu0 }
 0xaa2   :  { %v1515_v24 = vadd.f32 %v1509_v21, %v2018_v19 }
 0xaa3   :  { %v1511_v36 = vpop.f32.mrf.mxu0 }
 0xaa4   :  { %1517 = vst.msk [vmem:[#allocation8] sm:$0xff] %vm82_vm0, %v1515_v24  ;;  %v1512_v25 = vadd.f32 %v1511_v36, %v1468_v15 }
 0xaa5   :  { %v1684_v26 = vpop.f32.mrf.mxu0 }
 0xaa6   :  { %v1516_v27 = vadd.f32 %v1512_v25, %v2023_v23 }
 0xaa8   :  { %1518 = vst.msk [vmem:[#allocation8 + $0x8] sm:$0xff] %vm82_vm0, %v1516_v27 }
 0xaa9   :  { %1844 = shalt.err (!%p1841_p5)
}
 0xaaa   :  { %1530 = dma.vmem_to_hbm [thread:$0]  %s1525_s30, 256, %s2075_s5, [#allocation4], %s1861_s23, %s1861_s23, %s1862_s24  }
 0xaab   :  { %1857 = dma.done.wait [#allocation4], 256  }
 0xaac   :  { %1858 = vsyncadd [#allocation4], 4294967040 }
 0xaad   :  { %1534 = vsyncpa [#allocation3], 1 }
 0xaae   :  { %1535 = vsyncpa [#allocation6], 1 }
 0xaaf   :  { %1536 = vsyncpa [#allocation4], 1 }

</bundles_post_ra>
